<compile_context>
chip_gen: v6e
topology: v6e:2x2x1
jax: 0.10.0
libtpu: 0.0.40
codegen_flags: <defaults>
</compile_context>

<pallas_src>
import jax
import jax.numpy as jnp
from jax.experimental import pallas as pl
from jax.experimental.pallas import tpu as pltpu


def _copy_kernel(idx_ref, x_ref, o_ref):
    # idx_ref (SMEM, scalar-prefetched) is consumed by the BlockSpec index_maps;
    # the body just moves the selected temporal slab to the output slot.
    o_ref[...] = x_ref[...]


def _subsample_indices(t: int, num_samples: int) -> jax.Array:
    """Integer-exact torch.linspace(0, t-1, n).clamp(0, t-1).long()."""
    if num_samples == 1:
        return jnp.zeros((1,), dtype=jnp.int32)
    i = jnp.arange(num_samples, dtype=jnp.int32)
    idx = (i * (t - 1)) // (num_samples - 1)
    return jnp.clip(idx, 0, t - 1).astype(jnp.int32)


def uniform_temporal_subsample(x: jax.Array, num_samples: int) -> jax.Array:
    """Equivalent of UniformTemporalSubsample: gather along dim -3.

    x: (..., T, H, W)  ->  (..., num_samples, H, W)
    """
    assert x.ndim >= 3, "need at least (T, H, W)"
    *lead, T, H, W = x.shape
    C = 1
    for d in lead:
        C *= d

    indices = _subsample_indices(T, num_samples)

    # Lane-dense trailing layout when possible: (H, W) -> (H*W//128, 128).
    HW = H * W
    if HW % 128 == 0:
        D0, D1 = HW // 128, 128
    else:
        D0, D1 = H, W
    xr = x.reshape(C, T, D0, D1)

    itemsize = jnp.dtype(x.dtype).itemsize
    row_bytes = D0 * D1 * itemsize          # one channel-frame block
    budget = 12 * 1024 * 1024               # safe under every gen's scoped default

    # Largest divisor of C whose (2 in + 2 out buffers) working set fits budget.
    c_tile = 1
    for ct in range(C, 0, -1):
        if C % ct == 0 and 4 * ct * row_bytes <= budget:
            c_tile = ct
            break

    extra_params = {}
    if 4 * c_tile * row_bytes > budget:
        # Even a single-channel frame is large: raise the scoped VMEM limit.
        extra_params["vmem_limit_bytes"] = int(4 * row_bytes + (2 << 20))

    cost = pl.CostEstimate(
        flops=0,
        transcendentals=0,
        bytes_accessed=int(2 * C * num_samples * D0 * D1 * itemsize),
    )

    out = pl.pallas_call(
        _copy_kernel,
        out_shape=jax.ShapeDtypeStruct((C, num_samples, D0, D1), x.dtype),
        grid_spec=pltpu.PrefetchScalarGridSpec(
            num_scalar_prefetch=1,                      # `indices` -> SMEM
            grid=(C // c_tile, num_samples),
            in_specs=[
                # DMA the (c_tile, 1, D0, D1) slab for temporal index idx[s].
                pl.BlockSpec((c_tile, 1, D0, D1),
                             lambda c, s, idx: (c, idx[s], 0, 0)),
            ],
            out_specs=pl.BlockSpec((c_tile, 1, D0, D1),
                                   lambda c, s, idx: (c, s, 0, 0)),
        ),
        compiler_params=pltpu.CompilerParams(
            dimension_semantics=("parallel", "parallel"), **extra_params),
        cost_estimate=cost,
    )(indices, xr)

    return out.reshape(*lead, num_samples, H, W)


if __name__ == "__main__":
    key = jax.random.PRNGKey(0)

    # Case 1: lane-dense path (H*W % 128 == 0), video-like (C, T, H, W).
    C, T, H, W = 3, 8, 16, 16
    num_samples = 4
    x = jax.random.normal(key, (C, T, H, W), dtype=jnp.float32)
    out = jax.block_until_ready(uniform_temporal_subsample(x, num_samples))
    ref = jnp.take(x, _subsample_indices(T, num_samples), axis=-3)
    assert out.shape == (C, num_samples, H, W), out.shape
    assert out.dtype == x.dtype
    assert jnp.array_equal(out, ref), "mismatch (lane-dense path)"

    # Case 2: fallback path (H*W not a multiple of 128) + odd T.
    x2 = jax.random.normal(jax.random.PRNGKey(1), (2, 5, 6, 6), dtype=jnp.float32)
    out2 = jax.block_until_ready(uniform_temporal_subsample(x2, 3))
    ref2 = jnp.take(x2, _subsample_indices(5, 3), axis=-3)
    assert jnp.array_equal(out2, ref2), "mismatch (fallback path)"

    # Case 3: num_samples == 1 edge case.
    out3 = jax.block_until_ready(uniform_temporal_subsample(x, 1))
    assert jnp.array_equal(out3, x[:, :1]), "mismatch (num_samples == 1)"

    print("KERNEL_OK")
</pallas_src>

<mosaic_0001>
module attributes {stable_mosaic.version = 11 : i64} {
  func.func @_copy_kernel(%arg0: i32, %arg1: i32, %arg2: memref<4xi32, #tpu.memory_space<smem>>, %arg3: memref<3x1x2x128xf32, #tpu.memory_space<vmem>>, %arg4: memref<3x1x2x128xf32, #tpu.memory_space<vmem>>) attributes {dimension_semantics = [#tpu.dimension_semantics<parallel>, #tpu.dimension_semantics<parallel>], iteration_bounds = array<i64: 1, 4>, scalar_prefetch = 1 : i64, scratch_operands = 0 : i64, tpu.core_type = #tpu.core_type<tc>, window_params = [{transform_indices = @transform_0, window_bounds = array<i64: 3, 1, 2, 128>}, {transform_indices = @transform_1, window_bounds = array<i64: 3, 1, 2, 128>}]} {
    %c0 = arith.constant 0 : index
    %c0_0 = arith.constant 0 : index
    %c0_1 = arith.constant 0 : index
    %c0_2 = arith.constant 0 : index
    %0 = vector.load %arg3[%c0, %c0_0, %c0_1, %c0_2] : memref<3x1x2x128xf32, #tpu.memory_space<vmem>>, vector<3x1x2x128xf32>
    %c0_3 = arith.constant 0 : index
    %c0_4 = arith.constant 0 : index
    %c0_5 = arith.constant 0 : index
    %c0_6 = arith.constant 0 : index
    %1 = vector.load %arg4[%c0_3, %c0_4, %c0_5, %c0_6] : memref<3x1x2x128xf32, #tpu.memory_space<vmem>>, vector<3x1x2x128xf32>
    tpu.vector_store %arg4[%c0_3, %c0_4, %c0_5, %c0_6], %0 {strides = array<i32>} : memref<3x1x2x128xf32, #tpu.memory_space<vmem>>, vector<3x1x2x128xf32>,
    return
  }
  func.func @transform_0(%arg0: i32, %arg1: i32, %arg2: memref<4xi32, #tpu.memory_space<smem>>) -> (i32, i32, i32, i32) {
    %0 = arith.index_cast %arg1 : i32 to index
    %1 = memref.load %arg2[%0] : memref<4xi32, #tpu.memory_space<smem>>
    %c0_i32 = arith.constant 0 : i32
    %c0_i32_0 = arith.constant 0 : i32
    %c0_i32_1 = arith.constant 0 : i32
    return %arg0, %1, %c0_i32, %c0_i32_0 : i32, i32, i32, i32
  }
  func.func @transform_1(%arg0: i32, %arg1: i32, %arg2: memref<4xi32, #tpu.memory_space<smem>>) -> (i32, i32, i32, i32) {
    %c0_i32 = arith.constant 0 : i32
    %c0_i32_0 = arith.constant 0 : i32
    %c0_i32_1 = arith.constant 0 : i32
    return %arg0, %arg1, %c0_i32, %c0_i32_0 : i32, i32, i32, i32
  }
}

</mosaic_0001>

<bundles_post_ra>
// kernel: tpu_custom_call.1
= control target key start
LH: loop header
LB: loop body
LE: loop exit
PB: predicated region body
PF: predicated region fallthrough
CT: control target
= control target key end

     0   :  { %s524_s9 = smov [#allocation3]   ;;  %s752_s0 = inlined_call_operand.hbm [shape: s32[4], index: 0, kind: input, shape index: {}]   ;;  %s753_s1 = inlined_call_operand.hbm [shape: f32[3,8,2,128], index: 1, kind: input, shape index: {}]   ;;  %s754_s2 = inlined_call_operand.hbm [shape: f32[3,4,2,128], index: 2, kind: output, shape index: {}]  }
   0x1   :  { %8 = dma.hbm_to_smem %s752_s0, 16, %s524_s9, [#allocation2] }
   0x2   :  { %478 = dma.done.wait [#allocation2], 16 }
   0x3   :  { %479 = vsyncadd [#allocation2], 4294967280 }
   0x4   :  { %10 = sfence }
   0x5   :  { %11 = vsyncpa [#allocation5], 0 }
   0x6   :  { %13 = vsyncpa [#allocation5 + $0x1], 0 }
   0x7   :  { %14 = vsyncpa [#allocation6], 0 }
   0x8   :  { %16 = vsyncpa [#allocation6 + $0x1], 0  ;;  %s551_s12 = smov 0   ;;  %s553_s13 = smov 0  }
   0x9   :  { %s555_s14 = smov 0   ;;  %s557_s15 = smov 0  }
   0xa   :  { %s559_s16 = smov 0   ;;  %s561_s17 = smov 0  }
   0xb   :  { %s563_s0 = smov 0   ;;  %s565_s18 = smov 0  }
   0xc   :  { %s567_s19 = smov 0  }
   0xd LB: > { %s271_s20 = sadd.s32 4294967295, %s522_s19   ;;  %s272_s21 = sadd.s32 4294967294, %s522_s19   ;;  %s522_s19 = sphi %s567_s19, %s22_s19   ;;  %s518_s18 = sphi %s565_s18, %s774_s18   ;;  %s514_s0 = sphi %s563_s0, %s773_s0   ;;  %s510_s17 = sphi %s561_s17, %s772_s17   ;;  %s506_s16 = sphi %s559_s16, %s771_s16   ;;  %s502_s15 = sphi %s557_s15, %s770_s15   ;;  %s498_s14 = sphi %s555_s14, %s769_s14   ;;  %s494_s13 = sphi %s553_s13, %s768_s13   ;;  %s490_s12 = sphi %s551_s12, %s767_s12  }
   0xe   : > { %s31_s22 = sadd.s32 1, %s518_s18  ;;  %s38_s23 = sld [smem:[#allocation3 + %s518_s18]] }
   0xf   : > { %p32_p0 = scmp.ge.s32.totalorder %s31_s22, 4  ;;  %s45_s24 = sadd.s32 1, %s510_s17 }
  0x10   : > { %p52_p1 = scmp.ne.s32.totalorder %s510_s17, %s506_s16  ;;  %p53_p2 = scmp.eq.s32.totalorder %s522_s19, 0 }
  0x11   : > { %s776_s22 = smov (%p32_p0, %s31_s22), 0  ;;  %p58_p4 = scmp.ne.s32.totalorder %s506_s16, %s502_s15 }
  0x12   : > { %p604_p3 = por %p53_p2, %p52_p1  ;;  %s39_s26 = sld [smem:[#allocation3 + %s776_s22]] }
  0x13   : > { %p59_p5 = scmp.eq.s32.totalorder %s271_s20, 0  ;;  %s69_s27 = ssub.s32 %s518_s18, %s776_s22 }
  0x14   : > { %s73_s28 = sadd.s32 1, %s498_s14  ;;  %p71_p7 = scmp.eq.s32.totalorder %s69_s27, 0 }
  0x15   : > { %p613_p6 = por %p59_p5, %p58_p4  ;;  %p83_p8 = scmp.ne.s32.totalorder %s498_s14, %s494_s13 }
  0x16   : > { %p84_p9 = scmp.eq.s32.totalorder %s271_s20, 3  ;;  %p89_p11 = scmp.ne.s32.totalorder %s494_s13, %s490_s12 }
  0x17   : > { %s758_s29 = scalar_select %p613_p6, 1, 0 }
  0x18   : > { %s620_s30 = scalar_select %p71_p7, %s498_s14, %s73_s28  }
  0x19   : > { %p622_p10 = por %p84_p9, %p83_p8  ;;  %s41_s4 = ssub.s32 %s38_s23, %s39_s26 }
  0x1a   : > { %p90_p12 = scmp.eq.s32.totalorder %s272_s21, 3  ;;  %p43_p13 = scmp.eq.s32.totalorder %s41_s4, 0 }
  0x1b   : > { %s759_s3 = scalar_select %p622_p10, 1, 0 }
  0x1c   : > { %p628_p0 = por %p90_p12, %p89_p11  ;;  %p299_p1 = scmp.lt.s32.totalorder %s522_s19, 4 }
  0x1d   : > { %s634_s6 = scalar_select %p43_p13, %s510_s17, %s45_s24  }
  0x1e   : > { %s760_s5 = scalar_select %p628_p0, 1, 0 }
  0x1f   : > { %s110_s7 = sand.u32 1, %s510_s17   ;;  %p639_p2 = pnand %p299_p1, %p604_p3 }
  0x20   : > { %s280_s9 = smul.u32 6, %s110_s7  ;;  %p276_p4 = scmp.ge.s32.totalorder %s522_s19, 1 }
  0x21   : > { %s283_s10 = scalar_select %p604_p3, [#allocation3], [#allocation8] }
  0x22   : > { %s284_s11 = scalar_select %p604_p3, %s518_s18, 0 }
  0x23   : > { %s778_s10 = smov (!%p299_p1, %s283_s10), [#allocation9]  ;;  %s114_s20 = scalar_lea.vmem [#allocation4], %s280_s9 }
  0x24   : > { %s780_s11 = smov (!%p299_p1, %s284_s11), 0  ;;  %s124_s21 = sshll.u32 %s114_s20, 4  ;;  %s650_s21 = int_to_ptr.vmem [resolvable:$true] %s124_s21 }
  0x25   : > { %s115_s15 = sld [smem:[%s778_s10 + %s780_s11]]  ;;  %p132_p5 = scmp.lt.s32.totalorder %s522_s19, 5 }
  0x26   : > { %s661_s28 = scalar_lea.sflag [#allocation5], %s110_s7  ;;  %p390_p8 = pneg %p639_p2 }
  0x27   : > { %p652_p7 = pnand %p276_p4, %p132_p5  ;;  %s393_s11 = scalar_lea.hbm %s753_s1, 768 }
  0x29   : > { %s762_s23 = scalar_select %p652_p7, 1, 0 }
  0x2b   : > { %s275_s24 = sshll.u32 %s115_s15, 5 }
  0x2c   : > { %s659_s25 = scalar_lea.hbm %s753_s1, %s275_s24 }
  0x2d   : > { %s388_s4 = scalar_lea.hbm %s659_s25, 96  ;;  %p394_p12 = scmp.lt.s32.totalorder %s659_s25, %s753_s1 }
  0x2e   : > { %p389_p3 = scmp.ne.s32.totalorder %s659_s25, %s388_s4  ;;  %p395_p13 = scmp.lt.s32.totalorder %s393_s11, %s388_s4 }
  0x30   : > { %p391_p9 = pnand %p390_p8, %p389_p3  ;;  %p396_p1 = por %p395_p13, %p394_p12 }
  0x32   : > { %p392_p11 = pneg %p391_p9 }
  0x34   : > { %p397_p4 = pnand %p396_p1, %p392_p11 }
  0x36   : > { %400 = shalt.err (!%p397_p4)
}
  0x37   : > { %s401_s7 = scalar_lea.vmem %s650_s21, 96  ;;  %s525_s24 = smov [#allocation4]  }
  0x38   : > { %p402_p5 = scmp.ne.s32.totalorder %s650_s21, %s401_s7  ;;  %s406_s26 = sshll.u32 %s525_s24, 4  ;;  %s407_s26 = int_to_ptr.vmem [resolvable:$false] %s406_s26 }
  0x39   : > { %s408_s27 = scalar_lea.vmem %s407_s26, 192  ;;  %p409_p9 = scmp.lt.s32.totalorder %s650_s21, %s407_s26 }
  0x3a   : > { %p404_p0 = pnand %p402_p5, %p390_p8  ;;  %p410_p10 = scmp.lt.s32.totalorder %s408_s27, %s401_s7 }
  0x3c   : > { %p405_p3 = pneg %p404_p0  ;;  %p411_p6 = por %p410_p10, %p409_p9 }
  0x3e   : > { %p412_p7 = pnand %p411_p6, %p405_p3 }
  0x40   : > { %415 = shalt.err (!%p412_p7)
}
  0x41   : > { %s526_s4 = smov 256   ;;  %s527_s9 = smov 32  }
  0x42   : > { %s528_s10 = smov 2   ;;  %p763_p0 = scmp.ne.s32.totalorder %s762_s23, 0 }
  0x43   : > { %294 = dma.hbm_to_vmem [thread:$0]  (!%p639_p2), %s659_s25, 96, %s650_s21, %s661_s28, %s526_s4, %s527_s9, %s528_s10  }
  0x44   : > { %136 = sbr.rel (%p763_p0) target bundleno = 102 (0x66), region = 24  ;;  %s138_s11 = sand.u32 (!%p763_p0), 1, %s506_s16  }
  0x45   : > { %s281_s15 = smul.u32 (!%p763_p0), 6, %s138_s11  ;;  %s139_s20 = scalar_lea.sflag (!%p763_p0), [#allocation5], %s138_s11 }
  0x46   : > { %p764_p6 = scmp.ne.s32.totalorder (!%p763_p0), %s758_s29, 0 }
  0x47   : > { %s142_s7 = scalar_lea.vmem (!%p763_p0), [#allocation4], %s281_s15 }
  0x49   : > { %481 = dma.done.wait (%p764_p6), %s139_s20, 96  }
  0x4a   : > { %483 = vsyncadd (%p764_p6), %s139_s20, 4294967200  ;;  %s158_s24 = sand.u32 1, %s494_s13   ;;  %s277_s21 = sshll.u32 %s514_s0, 5  ;;  %v164_v0 = vld [vmem:[%s142_s7] sm:$0xf]  }
  0x4b   : > { %s282_s8 = smul.u32 6, %s158_s24  ;;  %s694_s27 = scalar_lea.hbm %s754_s2, %s277_s21  ;;  %v166_v1 = vld [vmem:[%s142_s7 + $0x4] sm:$0x3] }
  0x4c   : > { %s698_s29 = scalar_lea.sflag [#allocation6], %s158_s24  ;;  %p765_p2 = scmp.ne.s32.totalorder %s759_s3, 0 }
  0x4d   : > { %s160_s25 = scalar_lea.vmem [#allocation7], %s282_s8  ;;  %s529_s0 = smov [#allocation7]  }
  0x4e   : > { %s186_s23 = sshll.u32 %s160_s25, 4  ;;  %167 = vst [vmem:[%s160_s25] sm:$0xf] %v164_v0   ;;  %169 = vst [vmem:[%s160_s25 + $0x4] sm:$0x3] %v166_v1  ;;  %s420_s9 = sshll.u32 %s529_s0, 4  ;;  %s696_s23 = int_to_ptr.vmem [resolvable:$true] %s186_s23  ;;  %s421_s9 = int_to_ptr.vmem [resolvable:$false] %s420_s9 }
  0x4f   : > { %s416_s4 = scalar_lea.vmem %s696_s23, 96  ;;  %s422_s10 = scalar_lea.vmem %s421_s9, 192 }
  0x50   : > { %p417_p10 = scmp.ne.s32.totalorder %s696_s23, %s416_s4  ;;  %p423_p11 = scmp.lt.s32.totalorder %s696_s23, %s421_s9 }
  0x51   : > { %p424_p12 = scmp.lt.s32.totalorder %s422_s10, %s416_s4 }
  0x52   : > { %p418_p7 = pnand %p417_p10, %p765_p2 }
  0x53   : > { %p425_p13 = por %p424_p12, %p423_p11 }
  0x54   : > { %p419_p8 = pneg %p418_p7 }
  0x56   : > { %p426_p1 = pnand %p425_p13, %p419_p8 }
  0x58   : > { %429 = shalt.err (!%p426_p1)
}
  0x59   : > { %s430_s11 = scalar_lea.hbm %s694_s27, 96  ;;  %s434_s7 = scalar_lea.hbm %s754_s2, 384 }
  0x5a   : > { %p431_p4 = scmp.ne.s32.totalorder %s694_s27, %s430_s11  ;;  %p435_p9 = scmp.lt.s32.totalorder %s694_s27, %s754_s2 }
  0x5b   : > { %p436_p0 = scmp.lt.s32.totalorder %s434_s7, %s430_s11 }
  0x5c   : > { %p432_p5 = pnand %p431_p4, %p765_p2 }
  0x5d   : > { %p437_p6 = por %p436_p0, %p435_p9 }
  0x5e   : > { %p433_p3 = pneg %p432_p5 }
  0x60   : > { %p438_p10 = pnand %p437_p6, %p433_p3 }
  0x62   : > { %441 = shalt.err (!%p438_p10)
}
  0x63   : > { %s530_s21 = smov 32   ;;  %s531_s25 = smov 128  }
  0x64   : > { %s532_s28 = smov 2  }
  0x65   : > { %287 = dma.vmem_to_hbm [thread:$0]  (%p765_p2), %s696_s23, 96, %s694_s27, %s698_s29, %s530_s21, %s531_s25, %s532_s28  }
  0x66 PF: > { %p300_p7 = scmp.ge.s32.totalorder %s522_s19, 2  ;;  %s201_s26 = sand.u32 1, %s490_s12  }
  0x67   : > { %p766_p8 = scmp.ne.s32.totalorder %s760_s5, 0  ;;  %s202_s4 = scalar_lea.sflag [#allocation6], %s201_s26 }
  0x69   : > { %p296_p11 = pnand %p300_p7, %p766_p8 }
  0x6b   : > { %p297_p12 = pneg %p296_p11 }
  0x6d   : > { %485 = dma.done.wait (%p297_p12), %s202_s4, 96  }
  0x6e   : > { %487 = vsyncadd (%p297_p12), %s202_s4, 4294967200  ;;  %s22_s19 = sadd.s32 1, %s522_s19   ;;  %s767_s12 = smov %s494_s13 }
  0x6f   : > { %p19_p13 = scmp.ge.s32.totalorder %s22_s19, 6   ;;  %s768_s13 = smov %s498_s14 }
  0x70   : > { %s769_s14 = smov %s620_s30  ;;  %s770_s15 = smov %s506_s16 }
  0x71   : > { %s771_s16 = smov %s510_s17  ;;  %s772_s17 = smov %s634_s6 }
  0x72   : > { %s773_s0 = smov %s518_s18  ;;  %s774_s18 = smov %s776_s22 }
  0x73   :  { %21 = sbr.rel (!%p19_p13) target bundleno = 13 (0xd), region = 69 }
  0x78   :  { %207 = vsyncpa [#allocation5], 1 }
  0x79   :  { %209 = vsyncpa [#allocation5 + $0x1], 1 }
  0x7a   :  { %210 = vsyncpa [#allocation6], 1 }
  0x7b   :  { %212 = vsyncpa [#allocation6 + $0x1], 1 }

</bundles_post_ra>
